<compile_context>
chip_gen: v7x
topology: tpu7x:2x2x1
jax: 0.10.0
libtpu: 0.0.40
codegen_flags: <defaults>
</compile_context>

<pallas_src>
import functools

import jax
import jax.numpy as jnp
from jax import lax
from jax.experimental import pallas as pl
from jax.experimental.pallas import tpu as pltpu

LANES = 128
SUBLANES = 8
MAX_BLOCK_ROWS = 8192      # (8192, 128) f32 == 4 MiB per operand per buffer


def _focal_elementwise(p_raw, t_raw, alpha, gamma, binary_targets):
    """Per-element focal loss, matching torch BCELoss(reduction='none')-based
    FocalLoss (log terms clamped at -100 like PyTorch).

    binary_targets=True uses a single-log fast path that is exactly equivalent
    to the two-log BCE when targets are strictly {0, 1} (the module's stated
    contract). binary_targets=False keeps the full two-log BCE for soft labels.
    """
    p = p_raw.astype(jnp.float32)
    t = t_raw.astype(jnp.float32)

    is_pos = t == 1.0
    pt = jnp.where(is_pos, p, 1.0 - p)

    if binary_targets:
        # One EUP log instead of two; alpha select folded into one FMA.
        bce = -jnp.maximum(jnp.log(pt), -100.0)
        alpha_w = t * jnp.float32(2.0 * alpha - 1.0) + jnp.float32(1.0 - alpha)
    else:
        log_p = jnp.maximum(jnp.log(p), -100.0)
        log_1mp = jnp.maximum(jnp.log(1.0 - p), -100.0)
        bce = -(t * log_p + (1.0 - t) * log_1mp)
        alpha_w = jnp.where(is_pos, jnp.float32(alpha), jnp.float32(1.0 - alpha))

    d = 1.0 - pt
    if gamma == 2.0:            # fast path, default
        focal_w = d * d
    elif gamma == 1.0:
        focal_w = d
    elif gamma == float(int(gamma)) and 0.0 < gamma <= 8.0:
        focal_w = d
        for _ in range(int(gamma) - 1):
            focal_w = focal_w * d
    else:
        focal_w = jnp.power(d, jnp.float32(gamma))
    return alpha_w * focal_w * bce


def _focal_sum_kernel(p_ref, t_ref, *rest, alpha, gamma, binary_targets,
                      block_rows, rows_valid, n_inner, clean_blocks,
                      total_blocks, has_weights):
    if has_weights:
        w_ref, o_ref = rest
    else:
        (o_ref,) = rest

    i = pl.program_id(1)          # reduction ("arbitrary") axis

    # Output block index_map ignores i, so o_ref is VMEM-resident across the
    # whole inner axis: use it directly as the accumulator.
    @pl.when(i == 0)
    def _():
        o_ref[...] = jnp.zeros_like(o_ref)

    loss = _focal_elementwise(p_ref[...], t_ref[...], alpha, gamma,
                              binary_targets)
    if has_weights:
        loss = loss * w_ref[...].astype(jnp.float32)

    def accumulate(x):
        if block_rows % SUBLANES == 0:
            # Pure-VPU folds into the vreg-shaped (8,128) accumulator; the
            # single cross-lane/sublane reduce happens in the wrapper.
            o_ref[...] += x.reshape(-1, SUBLANES, LANES).sum(axis=0)
        else:
            # Tiny-input fallback (rows < 8 and not a multiple of 8).
            o_ref[0:1, :] += jnp.sum(x, axis=0, keepdims=True)

    if clean_blocks == total_blocks:
        # Every block is fully valid: no masking work anywhere.
        accumulate(loss)
    else:
        block_idx = pl.program_id(0) * n_inner + i

        @pl.when(block_idx < clean_blocks)
        def _():
            accumulate(loss)

        @pl.when(block_idx >= clean_blocks)
        def _():
            # Ragged last real block and/or phantom block introduced to keep
            # the 2-way outer split: mask invalid rows with a select (NOT a
            # multiply) so garbage NaN/Inf from the undefined region cannot
            # propagate; phantom blocks mask to all-zero.
            row_ids = block_idx * block_rows + lax.broadcasted_iota(
                jnp.int32, (block_rows, 1), 0)
            accumulate(jnp.where(row_ids < rows_valid, loss, 0.0))


def focal_loss(inputs, targets, weights=None, *, alpha=0.25, gamma=2.0,
               reduction="mean", from_logits=False, binary_targets=True,
               max_block_rows=MAX_BLOCK_ROWS):
    """Pallas TPU implementation of FocalLoss.forward (from_logits=False)."""
    if from_logits:
        # TODO(synk): from_logits=True (sigmoid + BCEWithLogitsLoss) path not
        # wired; the module default is from_logits=False, which is implemented.
        raise NotImplementedError("from_logits=True not implemented")
    if reduction not in ("mean", "sum"):
        # TODO(synk): reduction='none' (pure elementwise map) not exposed; only
        # the fused elementwise + reduction path is implemented.
        raise NotImplementedError("reduction='none' not implemented")

    n = inputs.size
    has_weights = weights is not None

    flat = [inputs.reshape(-1), targets.reshape(-1)]
    if has_weights:
        flat.append(weights.reshape(-1))

    n_main = (n // LANES) * LANES
    tail = n - n_main

    # Tail (< 128 elements): tiny plain-jnp reduction in the wrapper instead of
    # a jnp.pad read+write pass over every operand.
    if tail:
        tail_loss = _focal_elementwise(flat[0][n_main:], flat[1][n_main:],
                                       alpha, gamma, binary_targets)
        if has_weights:
            tail_loss = tail_loss * flat[2][n_main:].astype(jnp.float32)
        tail_sum = jnp.sum(tail_loss, dtype=jnp.float32)
    else:
        tail_sum = jnp.float32(0.0)

    if n_main == 0:
        total = tail_sum
    else:
        rows = n_main // LANES
        if tail:
            # TODO(synk): the prefix slice can still cost one extra HBM pass
            # when numel % 128 != 0; a manual 1-D DMA path would remove it.
            slabs = [a[:n_main].reshape(rows, LANES) for a in flat]
        else:
            slabs = [a.reshape(rows, LANES) for a in flat]   # zero-copy view

        if rows <= max_block_rows:
            block_rows = rows                 # single block == full array dims
            n_blocks = 1
        else:
            block_rows = max_block_rows
            n_blocks = -(-rows // block_rows)

        # Always give v7x's two TensorCores half the blocks each when there is
        # more than one block (odd counts get one masked phantom block).
        if n_blocks >= 2:
            n_outer = 2
            n_inner = -(-n_blocks // 2)
        else:
            n_outer, n_inner = 1, 1
        total_blocks = n_outer * n_inner
        clean_blocks = rows // block_rows     # blocks with every row valid

        kernel = functools.partial(
            _focal_sum_kernel, alpha=float(alpha), gamma=float(gamma),
            binary_targets=binary_targets, block_rows=block_rows,
            rows_valid=rows, n_inner=n_inner, clean_blocks=clean_blocks,
            total_blocks=total_blocks, has_weights=has_weights)

        last_block = n_blocks - 1
        if total_blocks > n_blocks:
            def row_map(o, i):                # clamp the phantom block
                return (jnp.minimum(o * n_inner + i, last_block), 0)
        else:
            def row_map(o, i):
                return (o * n_inner + i, 0)

        in_specs = [pl.BlockSpec((block_rows, LANES), row_map) for _ in slabs]

        # Size the scoped VMEM budget from the actual double-buffered tiles so
        # the large blocks compile on v5e (16 MiB default) and stay within
        # v7x's 64 MiB physical VMEM.
        block_buf_bytes = sum(2 * block_rows * LANES * a.dtype.itemsize
                              for a in slabs)
        vmem_limit = int(min(64 << 20,
                             max(32 << 20, block_buf_bytes + (4 << 20))))

        cost = pl.CostEstimate(
            flops=15 * n_main,
            transcendentals=(1 if binary_targets else 2) * n_main,
            bytes_accessed=sum(int(a.size) * a.dtype.itemsize for a in slabs)
            + SUBLANES * n_outer * LANES * 4)

        partials = pl.pallas_call(
            kernel,
            out_shape=jax.ShapeDtypeStruct((SUBLANES * n_outer, LANES),
                                           jnp.float32),
            grid_spec=pltpu.PrefetchScalarGridSpec(
                num_scalar_prefetch=0,
                grid=(n_outer, n_inner),
                in_specs=in_specs,
                out_specs=pl.BlockSpec((SUBLANES, LANES), lambda o, i: (o, 0)),
            ),
            compiler_params=pltpu.CompilerParams(
                dimension_semantics=("parallel", "arbitrary"),
                vmem_limit_bytes=vmem_limit),
            cost_estimate=cost,
        )(*slabs)

        total = jnp.sum(partials, dtype=jnp.float32) + tail_sum

    if reduction == "mean":
        return total / jnp.float32(n)
    return total


def _reference(inputs, targets, weights=None, alpha=0.25, gamma=2.0,
               reduction="mean"):
    """Pure-jnp port of the PyTorch module (two-log BCE, clamped at -100)."""
    p = inputs.astype(jnp.float32)
    t = targets.astype(jnp.float32)
    bce = -(t * jnp.maximum(jnp.log(p), -100.0)
            + (1.0 - t) * jnp.maximum(jnp.log(1.0 - p), -100.0))
    pt = jnp.where(t == 1.0, p, 1.0 - p)
    aw = jnp.where(t == 1.0, alpha, 1.0 - alpha)
    loss = aw * ((1.0 - pt) ** gamma) * bce
    if weights is not None:
        loss = loss * weights.astype(jnp.float32)
    return loss.mean() if reduction == "mean" else loss.sum()


if __name__ == "__main__":
    key = jax.random.PRNGKey(0)
    k1, k2, k3, k4, k5, k6, k7 = jax.random.split(key, 7)

    # Small NCHW shape consistent with a wildfire segmentation output.
    x = jax.random.uniform(k1, (2, 4, 16, 16), jnp.float32,
                           minval=1e-4, maxval=1.0 - 1e-4)   # probabilities
    tgt = (jax.random.uniform(k2, (2, 4, 16, 16)) > 0.8).astype(jnp.float32)
    wts = jax.random.uniform(k3, (2, 4, 16, 16), jnp.float32,
                             minval=0.5, maxval=2.0)

    out = jax.block_until_ready(focal_loss(x, tgt, wts))
    ref = _reference(x, tgt, wts)
    assert jnp.allclose(out, ref, rtol=1e-5, atol=1e-6), (out, ref)

    # No-weights (2-input-stream) path + sum reduction.
    out2 = jax.block_until_ready(focal_loss(x, tgt, reduction="sum"))
    ref2 = _reference(x, tgt, reduction="sum")
    assert jnp.allclose(out2, ref2, rtol=1e-5, atol=1e-5), (out2, ref2)

    # Two-log soft-label-safe path gives the same answer on binary targets.
    out2b = jax.block_until_ready(focal_loss(x, tgt, binary_targets=False))
    ref2b = _reference(x, tgt)
    assert jnp.allclose(out2b, ref2b, rtol=1e-5, atol=1e-6), (out2b, ref2b)

    # Medium shape with a small block override to exercise the tiled path:
    # 2100 rows / 512-row blocks -> 5 real blocks (odd), guaranteed 2-way outer
    # split with one phantom block, and a ragged (masked) last real block.
    xb = jax.random.uniform(k4, (1, 3, 256, 350), jnp.float32,
                            minval=1e-4, maxval=1.0 - 1e-4)
    tb = (jax.random.uniform(k5, (1, 3, 256, 350)) > 0.9).astype(jnp.float32)
    out3 = jax.block_until_ready(focal_loss(xb, tb, max_block_rows=512))
    ref3 = _reference(xb, tb)
    assert jnp.allclose(out3, ref3, rtol=1e-4, atol=1e-6), (out3, ref3)

    # numel % 128 != 0: multiple-of-128 prefix through the kernel + jnp tail.
    xc = jax.random.uniform(k6, (2, 3, 5, 7), jnp.float32,
                            minval=1e-4, maxval=1.0 - 1e-4)
    tc = (jax.random.uniform(k7, (2, 3, 5, 7)) > 0.7).astype(jnp.float32)
    out4 = jax.block_until_ready(focal_loss(xc, tc))
    ref4 = _reference(xc, tc)
    assert jnp.allclose(out4, ref4, rtol=1e-5, atol=1e-6), (out4, ref4)

    # Pure-tail case (numel < 128): kernel skipped entirely.
    out5 = jax.block_until_ready(focal_loss(xc[0, 0], tc[0, 0]))
    ref5 = _reference(xc[0, 0], tc[0, 0])
    assert jnp.allclose(out5, ref5, rtol=1e-5, atol=1e-6), (out5, ref5)

    print("KERNEL_OK")
</pallas_src>

<mosaic_0001>
module attributes {stable_mosaic.version = 11 : i64} {
  func.func @_focal_sum_kernel(%arg0: i32, %arg1: i32, %arg2: memref<16x128xf32, #tpu.memory_space<vmem>>, %arg3: memref<16x128xf32, #tpu.memory_space<vmem>>, %arg4: memref<16x128xf32, #tpu.memory_space<vmem>>, %arg5: memref<8x128xf32, #tpu.memory_space<vmem>>) attributes {dimension_semantics = [#tpu.dimension_semantics<parallel>, #tpu.dimension_semantics<arbitrary>], iteration_bounds = array<i64: 1, 1>, scalar_prefetch = 0 : i64, scratch_operands = 0 : i64, tpu.core_type = #tpu.core_type<tc>, window_params = [{transform_indices = @transform_0, window_bounds = array<i64: 16, 128>}, {transform_indices = @transform_1, window_bounds = array<i64: 16, 128>}, {transform_indices = @transform_2, window_bounds = array<i64: 16, 128>}, {transform_indices = @transform_3, window_bounds = array<i64: 8, 128>}]} {
    %c0_i32 = arith.constant 0 : i32
    %0 = arith.cmpi eq, %arg1, %c0_i32 : i32
    %1 = arith.extui %0 : i1 to i32
    %c0_i32_0 = arith.constant 0 : i32
    %2 = arith.cmpi ne, %1, %c0_i32_0 : i32
    scf.if %2 {
      %cst_17 = arith.constant 0.000000e+00 : f32
      %31 = vector.broadcast %cst_17 : f32 to vector<8x128xf32>
      %c0_18 = arith.constant 0 : index
      %c0_19 = arith.constant 0 : index
      %32 = vector.load %arg5[%c0_18, %c0_19] : memref<8x128xf32, #tpu.memory_space<vmem>>, vector<8x128xf32>
      tpu.vector_store %arg5[%c0_18, %c0_19], %31 {strides = array<i32>} : memref<8x128xf32, #tpu.memory_space<vmem>>, vector<8x128xf32>,
    } else {
    }
    %c0 = arith.constant 0 : index
    %c0_1 = arith.constant 0 : index
    %3 = vector.load %arg2[%c0, %c0_1] : memref<16x128xf32, #tpu.memory_space<vmem>>, vector<16x128xf32>
    %c0_2 = arith.constant 0 : index
    %c0_3 = arith.constant 0 : index
    %4 = vector.load %arg3[%c0_2, %c0_3] : memref<16x128xf32, #tpu.memory_space<vmem>>, vector<16x128xf32>
    %cst = arith.constant 1.000000e+00 : f32
    %5 = vector.broadcast %cst : f32 to vector<16x128xf32>
    %6 = arith.cmpf oeq, %4, %5 : vector<16x128xf32>
    %cst_4 = arith.constant 1.000000e+00 : f32
    %7 = vector.broadcast %cst_4 : f32 to vector<16x128xf32>
    %8 = arith.subf %7, %3 : vector<16x128xf32>
    %9 = arith.select %6, %3, %8 : vector<16x128xi1>, vector<16x128xf32>
    %10 = math.log %9 : vector<16x128xf32>
    %cst_5 = arith.constant -1.000000e+02 : f32
    %11 = vector.broadcast %cst_5 : f32 to vector<16x128xf32>
    %12 = arith.maximumf %10, %11 : vector<16x128xf32>
    %cst_6 = arith.constant 0.000000e+00 : f32
    %13 = vector.broadcast %cst_6 : f32 to vector<16x128xf32>
    %14 = arith.subf %13, %12 : vector<16x128xf32>
    %cst_7 = arith.constant -5.000000e-01 : f32
    %15 = vector.broadcast %cst_7 : f32 to vector<16x128xf32>
    %16 = arith.mulf %4, %15 : vector<16x128xf32>
    %cst_8 = arith.constant 7.500000e-01 : f32
    %17 = vector.broadcast %cst_8 : f32 to vector<16x128xf32>
    %18 = arith.addf %16, %17 : vector<16x128xf32>
    %cst_9 = arith.constant 1.000000e+00 : f32
    %19 = vector.broadcast %cst_9 : f32 to vector<16x128xf32>
    %20 = arith.subf %19, %9 : vector<16x128xf32>
    %21 = arith.mulf %20, %20 : vector<16x128xf32>
    %22 = arith.mulf %18, %21 : vector<16x128xf32>
    %23 = arith.mulf %22, %14 : vector<16x128xf32>
    %c0_10 = arith.constant 0 : index
    %c0_11 = arith.constant 0 : index
    %24 = vector.load %arg4[%c0_10, %c0_11] : memref<16x128xf32, #tpu.memory_space<vmem>>, vector<16x128xf32>
    %25 = arith.mulf %23, %24 : vector<16x128xf32>
    %c0_12 = arith.constant 0 : index
    %c0_13 = arith.constant 0 : index
    %26 = vector.load %arg5[%c0_12, %c0_13] : memref<8x128xf32, #tpu.memory_space<vmem>>, vector<8x128xf32>
    %27 = vector.shape_cast %25 : vector<16x128xf32> to vector<2x8x128xf32>
    %cst_14 = arith.constant dense<0.000000e+00> : vector<8x128xf32>
    %28 = vector.multi_reduction <add>, %27, %cst_14 [0] : vector<2x8x128xf32> to vector<8x128xf32>
    %29 = arith.addf %26, %28 : vector<8x128xf32>
    %c0_15 = arith.constant 0 : index
    %c0_16 = arith.constant 0 : index
    %30 = vector.load %arg5[%c0_15, %c0_16] : memref<8x128xf32, #tpu.memory_space<vmem>>, vector<8x128xf32>
    tpu.vector_store %arg5[%c0_15, %c0_16], %29 {strides = array<i32>} : memref<8x128xf32, #tpu.memory_space<vmem>>, vector<8x128xf32>,
    return
  }
  func.func @transform_0(%arg0: i32, %arg1: i32) -> (i32, i32) {
    %c1_i32 = arith.constant 1 : i32
    %0 = arith.muli %arg0, %c1_i32 : i32
    %1 = arith.addi %0, %arg1 : i32
    %c0_i32 = arith.constant 0 : i32
    %c0_i32_0 = arith.constant 0 : i32
    return %1, %c0_i32 : i32, i32
  }
  func.func @transform_1(%arg0: i32, %arg1: i32) -> (i32, i32) {
    %c1_i32 = arith.constant 1 : i32
    %0 = arith.muli %arg0, %c1_i32 : i32
    %1 = arith.addi %0, %arg1 : i32
    %c0_i32 = arith.constant 0 : i32
    %c0_i32_0 = arith.constant 0 : i32
    return %1, %c0_i32 : i32, i32
  }
  func.func @transform_2(%arg0: i32, %arg1: i32) -> (i32, i32) {
    %c1_i32 = arith.constant 1 : i32
    %0 = arith.muli %arg0, %c1_i32 : i32
    %1 = arith.addi %0, %arg1 : i32
    %c0_i32 = arith.constant 0 : i32
    %c0_i32_0 = arith.constant 0 : i32
    return %1, %c0_i32 : i32, i32
  }
  func.func @transform_3(%arg0: i32, %arg1: i32) -> (i32, i32) {
    %c0_i32 = arith.constant 0 : i32
    %c0_i32_0 = arith.constant 0 : i32
    return %arg0, %c0_i32 : i32, i32
  }
}

</mosaic_0001>

<bundles_post_ra>
// kernel: tpu_custom_call.1
= control target key start
LH: loop header
LB: loop body
LE: loop exit
PB: predicated region body
PF: predicated region fallthrough
CT: control target
= control target key end

     0   :  { %8 = vsyncpa [#allocation3], 0  ;;  %s328_s0 = inlined_call_operand.hbm [shape: f32[16,128], index: 0, kind: input, shape index: {}]   ;;  %s329_s1 = inlined_call_operand.hbm [shape: f32[16,128], index: 1, kind: input, shape index: {}]   ;;  %s330_s2 = inlined_call_operand.hbm [shape: f32[16,128], index: 2, kind: input, shape index: {}]   ;;  %s331_s3 = inlined_call_operand.hbm [shape: f32[8,128], index: 3, kind: output, shape index: {}]  }
   0x1   :  { %9 = vsyncpa [#allocation6], 0 }
   0x2   :  { %10 = vsyncpa [#allocation4], 0  ;;  %s238_s12 = smov [#allocation5]   ;;  %s239_s14 = smov [#allocation2]  }
   0x3   :  { %s36_s13 = sshll.u32 %s238_s12, 4  ;;  %s20_s15 = sshll.u32 %s239_s14, 4  ;;  %s37_s13 = int_to_ptr.vmem [resolvable:$true] %s36_s13  ;;  %s264_s15 = int_to_ptr.vmem [resolvable:$true] %s20_s15 }
   0x4   :  { %s144_s18 = scalar_lea.hbm %s329_s1, 256 }
   0x5   :  { %p145_p0 = scmp.ne.s32.totalorder %s329_s1, %s144_s18  ;;  %p148_p1 = scmp.lt.u32.totalorder %s144_s18, %s329_s1 }
   0x7   :  { %p150_p2 = pnand %p148_p1, %p145_p0 }
   0x9   :  { %153 = shalt.err (!%p150_p2)
}
   0xa   :  { %s154_s23 = scalar_lea.vmem %s37_s13, 256  ;;  %p159_p4 = scmp.lt.s32.totalorder %s37_s13, %s37_s13 }
   0xb   :  { %p155_p3 = scmp.ne.s32.totalorder %s37_s13, %s154_s23  ;;  %p160_p5 = scmp.lt.s32.totalorder %s154_s23, %s154_s23 }
   0xd   :  { %p161_p6 = por %p160_p5, %p159_p4 }
   0xf   :  { %p162_p7 = pnand %p161_p6, %p155_p3 }
  0x11   :  { %165 = shalt.err (!%p162_p7)
}
  0x12   :  { %s240_s24 = smov 128   ;;  %s241_s25 = smov 8  }
  0x13   :  { %42 = dma.hbm_to_vmem [thread:$0]  %s329_s1, 256, %s37_s13, [#allocation6], %s240_s24, %s240_s24, %s241_s25  }
  0x14   :  { %s166_s30 = scalar_lea.hbm %s328_s0, 256 }
  0x15   :  { %p167_p8 = scmp.ne.s32.totalorder %s328_s0, %s166_s30  ;;  %p170_p9 = scmp.lt.u32.totalorder %s166_s30, %s328_s0 }
  0x17   :  { %p172_p10 = pnand %p170_p9, %p167_p8 }
  0x19   :  { %175 = shalt.err (!%p172_p10)
}
  0x1a   :  { %s176_s8 = scalar_lea.vmem %s264_s15, 256  ;;  %p181_p12 = scmp.lt.s32.totalorder %s264_s15, %s264_s15 }
  0x1b   :  { %p177_p11 = scmp.ne.s32.totalorder %s264_s15, %s176_s8  ;;  %p182_p13 = scmp.lt.s32.totalorder %s176_s8, %s176_s8 }
  0x1d   :  { %p183_p0 = por %p182_p13, %p181_p12 }
  0x1f   :  { %p184_p1 = pnand %p183_p0, %p177_p11 }
  0x21   :  { %187 = shalt.err (!%p184_p1)
}
  0x22   :  { %26 = dma.hbm_to_vmem [thread:$0]  %s328_s0, 256, %s264_s15, [#allocation3], %s240_s24, %s240_s24, %s241_s25  }
  0x23   :  { %s242_s10 = smov [#allocation7]   ;;  %s188_s14 = scalar_lea.hbm %s330_s2, 256 }
  0x24   :  { %s52_s11 = sshll.u32 %s242_s10, 4  ;;  %p189_p2 = scmp.ne.s32.totalorder %s330_s2, %s188_s14  ;;  %s53_s11 = int_to_ptr.vmem [resolvable:$true] %s52_s11 }
  0x25   :  { %p192_p3 = scmp.lt.u32.totalorder %s188_s14, %s330_s2 }
  0x27   :  { %p194_p4 = pnand %p192_p3, %p189_p2 }
  0x29   :  { %197 = shalt.err (!%p194_p4)
}
  0x2a   :  { %s198_s20 = scalar_lea.vmem %s53_s11, 256  ;;  %p203_p6 = scmp.lt.s32.totalorder %s53_s11, %s53_s11 }
  0x2b   :  { %p199_p5 = scmp.ne.s32.totalorder %s53_s11, %s198_s20  ;;  %p204_p7 = scmp.lt.s32.totalorder %s198_s20, %s198_s20 }
  0x2d   :  { %p205_p8 = por %p204_p7, %p203_p6 }
  0x2f   :  { %p206_p9 = pnand %p205_p8, %p199_p5 }
  0x31   :  { %209 = shalt.err (!%p206_p9)
}
  0x32   :  { %58 = dma.hbm_to_vmem [thread:$0]  %s330_s2, 256, %s53_s11, [#allocation6], %s240_s24, %s240_s24, %s241_s25  }
  0x33   :  { %232 = dma.done.wait [#allocation3], 256  }
  0x34   :  { %233 = vsyncadd [#allocation3], 4294967040 }
  0x35   :  { %234 = dma.done.wait [#allocation6], 512  }
  0x36   :  { %235 = vsyncadd [#allocation6], 4294966784  ;;  %v79_v0 = vld [vmem:[#allocation2] sm:$0xff]  ;;  %v80_v1 = vld [vmem:[#allocation2 + $0x8] sm:$0xff]  ;;  %s243_s2 = smov [#allocation8]  }
  0x37   :  { %v81_v2 = vld [vmem:[#allocation5] sm:$0xff]  ;;  %v82_v3 = vld [vmem:[#allocation5 + $0x8] sm:$0xff]  ;;  %v85_v4 = vsub.f32 1.0, %v79_v0  ;;  %v86_v5 = vsub.f32 1.0, %v80_v1  ;;  %v109_v26 = vld [vmem:[#allocation7] sm:$0xff]  ;;  %s123_s21 = sshll.u32 %s243_s2, 4  ;;  %s124_s21 = int_to_ptr.vmem [resolvable:$true] %s123_s21 }
  0x38   :  { %vm83_vm0 = vcmp.eq.f32.partialorder %v81_v2, 1.0  ;;  %vm84_vm1 = vcmp.eq.f32.partialorder %v82_v3, 1.0  ;;  %v97_v8 = vmul.f32 -0.5, %v81_v2  ;;  %v98_v10 = vmul.f32 -0.5, %v82_v3  ;;  %v110_v28 = vld [vmem:[#allocation7 + $0x8] sm:$0xff]  ;;  %s210_s22 = scalar_lea.vmem %s124_s21, 128  ;;  %p215_p11 = scmp.lt.s32.totalorder %s124_s21, %s124_s21 }
  0x39   :  { %v87_v6 = vsel %vm83_vm0, %v79_v0, %v85_v4  ;;  %v88_v7 = vsel %vm84_vm1, %v80_v1, %v86_v5  ;;  %p211_p10 = scmp.ne.s32.totalorder %s124_s21, %s210_s22  ;;  %p216_p12 = scmp.lt.s32.totalorder %s210_s22, %s210_s22 }
  0x3a   :  { %140 = vlog2.f32 %v87_v6  ;;  %v101_v9 = vsub.f32 1.0, %v87_v6  ;;  %v102_v11 = vsub.f32 1.0, %v88_v7  ;;  %v99_v12 = vadd.f32 0.75, %v97_v8 }
  0x3b   :  { %142 = vlog2.f32 %v88_v7  ;;  %v100_v15 = vadd.f32 0.75, %v98_v10  ;;  %p217_p13 = por %p216_p12, %p215_p11 }
  0x3c   :  { %v103_v13 = vmul.f32 %v101_v9, %v101_v9  ;;  %v104_v16 = vmul.f32 %v102_v11, %v102_v11 }
  0x3d   :  { %p218_p0 = pnand %p217_p13, %p211_p10 }
  0x3e   :  { %v105_v21 = vmul.f32 %v103_v13, %v99_v12  ;;  %v106_v23 = vmul.f32 %v104_v16, %v100_v15 }
  0x44   :  { %v141_v14 = vpop.eup %140 }
  0x45   :  { %v143_v17 = vpop.eup %142  ;;  %v90_v18 = vmul.f32 0.6931472, %v141_v14 }
  0x46   :  { %v92_v19 = vmul.f32 0.6931472, %v143_v17 }
  0x47   :  { %v93_v20 = vmax.f32 %v90_v18, -100.0 }
  0x48   :  { %v94_v22 = vmax.f32 %v92_v19, -100.0 }
  0x49   :  { %v95_v24 = vsub.f32 0.0, %v93_v20 }
  0x4a   :  { %v96_v25 = vsub.f32 0.0, %v94_v22 }
  0x4b   :  { %v107_v27 = vmul.f32 %v105_v21, %v95_v24 }
  0x4c   :  { %v108_v29 = vmul.f32 %v106_v23, %v96_v25 }
  0x4d   :  { %v111_v30 = vmul.f32 %v109_v26, %v107_v27 }
  0x4e   :  { %v112_v31 = vmul.f32 %v110_v28, %v108_v29 }
  0x50   :  { %v114_v32 = vadd.f32 %v112_v31, %v111_v30 }
  0x52   :  { %116 = vst [vmem:[#allocation8] sm:$0xff] %v114_v32 }
  0x53   :  { %221 = shalt.err (!%p218_p0)
}
  0x54   :  { %s222_s25 = scalar_lea.hbm %s331_s3, 128 }
  0x55   :  { %p223_p1 = scmp.ne.s32.totalorder %s331_s3, %s222_s25  ;;  %p226_p2 = scmp.lt.u32.totalorder %s222_s25, %s331_s3 }
  0x57   :  { %p228_p3 = pnand %p226_p2, %p223_p1 }
  0x59   :  { %231 = shalt.err (!%p228_p3)
}
  0x5a   :  { %126 = dma.vmem_to_hbm [thread:$0]  %s124_s21, 128, %s331_s3, [#allocation4]  }
  0x5b   :  { %236 = dma.done.wait [#allocation4], 128  }
  0x5c   :  { %237 = vsyncadd [#allocation4], 4294967168 }
  0x5d   :  { %130 = vsyncpa [#allocation3], 1 }
  0x5e   :  { %131 = vsyncpa [#allocation6], 1 }
  0x5f   :  { %132 = vsyncpa [#allocation4], 1 }

</bundles_post_ra>
